<compile_context>
chip_gen: v7x
topology: tpu7x:2x2x1
jax: 0.10.0
libtpu: 0.0.40
codegen_flags: <defaults>
</compile_context>

<pallas_src>
import jax
import jax.numpy as jnp
from jax.experimental import pallas as pl
from jax.experimental.pallas import tpu as pltpu

EPS = 1e-5
SUBLANE = 8


def _round_up(x, m):
    return ((x + m - 1) // m) * m


def _cdiv(a, b):
    return (a + b - 1) // b


def _vmem_capacity_bytes():
    """Generation-aware VMEM capacity (v5e/v6e: 128 MiB, v7x: 64 MiB)."""
    try:
        return int(pltpu.get_tpu_info().vmem_capacity_bytes)
    except Exception:
        return 64 << 20  # conservative fallback (v7x per-core size)


def _vmem_estimate(tm, f, b, param_bytes):
    """Per-step VMEM use: double-buffered in/out activation tiles, the f32
    intermediates, the bf16 copies feeding the MXU, and (double-buffered)
    parameter blocks."""
    act = 2 * 2 * tm * f * 4                 # in + out tiles, 2-deep, f32
    inter = tm * f * 4 + tm * b * 4          # f32 BN / dot results
    inter += tm * f * 2 + tm * b * 2         # bf16 matmul-input copies
    return act + inter + 2 * param_bytes


# ---------------------------------------------------------------------------
# Kernel
# ---------------------------------------------------------------------------
def _skipblock_kernel(x_ref, s1_ref, t1_ref, w1_ref, b1_ref, w2_ref, b2_ref,
                      o_ref):
    """Fused: BN1(folded FMA) -> ReLU -> Linear1(+BN2 folded) -> ReLU ->
    Linear2 -> +x.  One (TM, F) activation tile per grid step; all weights
    stay VMEM-resident via constant index_maps."""
    # BN1 (eval) folded into scale/shift, then ReLU1.  Dropout1 == identity.
    h = jnp.maximum(x_ref[...] * s1_ref[...] + t1_ref[...], 0.0)

    # Linear1 (weight-normalized, BN2 folded in); bf16 feeds MXU, f32 acc.
    h = jnp.dot(h.astype(jnp.bfloat16), w1_ref[...],
                preferred_element_type=jnp.float32) + b1_ref[...]
    h = jnp.maximum(h, 0.0)                  # ReLU2; Dropout2 == identity.

    # Linear2 (weight-normalized).
    h = jnp.dot(h.astype(jnp.bfloat16), w2_ref[...],
                preferred_element_type=jnp.float32) + b2_ref[...]

    # Residual: re-read the still VMEM-resident input tile (no long-lived
    # f32 copy of x across both matmuls -> no vreg spill at large TM).
    o_ref[...] = (h + x_ref[...]).astype(o_ref.dtype)


# ---------------------------------------------------------------------------
# Wrapper
# ---------------------------------------------------------------------------
@jax.jit
def skipblock_forward(x, folded):
    """x: (N, F) float32.  folded: dict from fold_params()."""
    n, f = x.shape
    b = folded["w1"].shape[1]                # bottleneck width

    param_args = (folded["s1"], folded["t1"], folded["w1"], folded["b1"],
                  folded["w2"], folded["b2"])
    param_bytes = sum(int(a.size) * a.dtype.itemsize for a in param_args)

    vmem_cap = _vmem_capacity_bytes()
    budget = int(vmem_cap * 0.6)             # headroom for compiler scratch

    # Batch tile: large (amortize ~0.35us/step, >=85% of HBM roofline at
    # 512-1024 rows), multiple of 8 sublanes, >=2 grid steps when the batch
    # allows it (v7x megacore), and within the generation's VMEM budget.
    tm_cap = 1024 if f <= 512 else 512
    tm = min(tm_cap, _round_up(n, SUBLANE))
    if n > SUBLANE:
        tm = min(tm, _round_up(_cdiv(n, 2), SUBLANE))
    while tm > SUBLANE and _vmem_estimate(tm, f, b, param_bytes) > budget:
        tm = _round_up(tm // 2, SUBLANE)

    n_pad = _round_up(n, tm)
    x_in = x.astype(jnp.float32)
    if n_pad != n:                           # batch-only pad (features untouched)
        x_in = jnp.pad(x_in, ((0, n_pad - n), (0, 0)))

    act_spec = pl.BlockSpec((tm, f), lambda i: (i, 0))
    # Parameters: whole-array blocks, constant index_map -> fetched once and
    # VMEM-resident across the batch grid.
    param_specs = [pl.BlockSpec(a.shape, lambda i: (0, 0)) for a in param_args]

    vmem_limit = int(min(max(_vmem_estimate(tm, f, b, param_bytes) + (4 << 20),
                             32 << 20),
                         int(vmem_cap * 0.9)))

    out = pl.pallas_call(
        _skipblock_kernel,
        out_shape=jax.ShapeDtypeStruct((n_pad, f), jnp.float32),
        grid=(n_pad // tm,),
        in_specs=[act_spec] + param_specs,
        out_specs=act_spec,
        compiler_params=pltpu.CompilerParams(
            dimension_semantics=("parallel",),
            vmem_limit_bytes=vmem_limit),
    )(x_in, *param_args)

    if n_pad != n:
        out = out[:n]
    return out.astype(x.dtype)


# ---------------------------------------------------------------------------
# Parameter construction (PyTorch-equivalent) + folding
# ---------------------------------------------------------------------------
def weight_norm(v, g):
    """nn.utils.weight_norm with dim=0: per-output-row L2 normalization.
    (PyTorch also has no epsilon here; a zero row would NaN in both.)"""
    norm = jnp.sqrt(jnp.sum(v * v, axis=1, keepdims=True))
    return g[:, None] * v / norm


def make_params(key, in_features, hidden_features, bottleneck_factor=0.5):
    """Raw (unfolded) eval-mode parameters, matching the module."""
    bneck = int(hidden_features * bottleneck_factor)
    ks = jax.random.split(key, 10)

    gamma1 = 1.0 + 0.1 * jax.random.normal(ks[0], (1, in_features), jnp.float32)
    beta1 = 0.1 * jax.random.normal(ks[1], (1, in_features), jnp.float32)
    mean1 = 0.1 * jax.random.normal(ks[2], (1, in_features), jnp.float32)
    var1 = 1.0 + 0.1 * jax.random.uniform(ks[3], (1, in_features), jnp.float32)

    v1 = jax.random.normal(ks[4], (bneck, in_features), jnp.float32) * 0.1
    g1 = 1.0 + 0.05 * jax.random.normal(ks[5], (bneck,), jnp.float32)
    w1_eff = weight_norm(v1, g1)                      # (bneck, in)
    b1 = 0.05 * jax.random.normal(ks[6], (1, bneck), jnp.float32)

    gamma2 = 1.0 + 0.1 * jax.random.normal(ks[7], (1, bneck), jnp.float32)
    beta2 = 0.1 * jax.random.normal(ks[8], (1, bneck), jnp.float32)
    mean2 = 0.05 * jnp.ones((1, bneck), jnp.float32)
    var2 = 1.1 * jnp.ones((1, bneck), jnp.float32)

    k9a, k9b, k9c = jax.random.split(ks[9], 3)
    v2 = jax.random.normal(k9a, (in_features, bneck), jnp.float32) * 0.1
    g2 = 1.0 + 0.05 * jax.random.normal(k9b, (in_features,), jnp.float32)
    w2_eff = weight_norm(v2, g2)                      # (in, bneck)
    b2 = 0.05 * jax.random.normal(k9c, (1, in_features), jnp.float32)

    return {
        "gamma1": gamma1, "beta1": beta1, "mean1": mean1, "var1": var1,
        "w1": w1_eff.T, "b1": b1,                     # (in, bneck)
        "gamma2": gamma2, "beta2": beta2, "mean2": mean2, "var2": var2,
        "w2": w2_eff.T, "b2": b2,                     # (bneck, in)
    }


def fold_params(p):
    """Fold BN1 -> (scale, shift), fold BN2 into Linear1; cast matmul weights
    to bf16 for the MXU.  No feature padding (kernel runs at true shapes)."""
    s1 = p["gamma1"] / jnp.sqrt(p["var1"] + EPS)              # (1, F)
    t1 = p["beta1"] - p["mean1"] * s1
    s2 = p["gamma2"] / jnp.sqrt(p["var2"] + EPS)              # (1, bneck)
    w1f = p["w1"] * s2                                        # column-scale
    b1f = (p["b1"] - p["mean2"]) * s2 + p["beta2"]
    return {
        "s1": s1.astype(jnp.float32),
        "t1": t1.astype(jnp.float32),
        "w1": w1f.astype(jnp.bfloat16),    # (F, bneck)
        "b1": b1f.astype(jnp.float32),
        "w2": p["w2"].astype(jnp.bfloat16),  # (bneck, F)
        "b2": p["b2"].astype(jnp.float32),
    }


# ---------------------------------------------------------------------------
# References
# ---------------------------------------------------------------------------
def reference_forward_f32(x, p):
    """Pure-JAX, full-f32 eval-mode SKIPblock forward (module semantics)."""
    h = (x - p["mean1"]) / jnp.sqrt(p["var1"] + EPS) * p["gamma1"] + p["beta1"]
    h = jnp.maximum(h, 0.0)
    h = h @ p["w1"] + p["b1"]
    h = (h - p["mean2"]) / jnp.sqrt(p["var2"] + EPS) * p["gamma2"] + p["beta2"]
    h = jnp.maximum(h, 0.0)
    h = h @ p["w2"] + p["b2"]
    return h + x


def reference_forward_bf16(x, folded):
    """Same math/precision recipe the kernel uses (folded params, bf16 MXU)."""
    h = jnp.maximum(x * folded["s1"] + folded["t1"], 0.0)
    h = jnp.dot(h.astype(jnp.bfloat16), folded["w1"],
                preferred_element_type=jnp.float32) + folded["b1"]
    h = jnp.maximum(h, 0.0)
    h = jnp.dot(h.astype(jnp.bfloat16), folded["w2"],
                preferred_element_type=jnp.float32) + folded["b2"]
    return h + x


# ---------------------------------------------------------------------------
if __name__ == "__main__":
    key = jax.random.PRNGKey(0)
    kx, kp = jax.random.split(key)

    batch = 8
    in_features = 32
    hidden_features = 32          # bottleneck = int(32 * 0.5) = 16

    x = jax.random.normal(kx, (batch, in_features), jnp.float32)
    raw = make_params(kp, in_features, hidden_features)
    folded = fold_params(raw)

    out = jax.block_until_ready(skipblock_forward(x, folded))
    assert out.shape == (batch, in_features)

    ref_bf16 = reference_forward_bf16(x, folded)
    ref_f32 = reference_forward_f32(x, raw)

    # Tight check vs. the kernel's own precision recipe ...
    assert jnp.allclose(out, ref_bf16, atol=1e-3, rtol=1e-3), \
        "mismatch vs bf16-precision reference"
    # ... and looser check vs. full-f32 module semantics (bf16 MXU error).
    assert jnp.allclose(out, ref_f32, atol=5e-2, rtol=5e-2), \
        "mismatch vs f32 eval-mode reference"

    print("KERNEL_OK")
</pallas_src>

<mosaic_0001>
module attributes {stable_mosaic.version = 11 : i64} {
  func.func @_skipblock_kernel(%arg0: i32, %arg1: memref<8x32xf32, #tpu.memory_space<vmem>>, %arg2: memref<1x32xf32, #tpu.memory_space<vmem>>, %arg3: memref<1x32xf32, #tpu.memory_space<vmem>>, %arg4: memref<32x16xbf16, #tpu.memory_space<vmem>>, %arg5: memref<1x16xf32, #tpu.memory_space<vmem>>, %arg6: memref<16x32xbf16, #tpu.memory_space<vmem>>, %arg7: memref<1x32xf32, #tpu.memory_space<vmem>>, %arg8: memref<8x32xf32, #tpu.memory_space<vmem>>) attributes {dimension_semantics = [#tpu.dimension_semantics<parallel>], iteration_bounds = array<i64: 1>, scalar_prefetch = 0 : i64, scratch_operands = 0 : i64, tpu.core_type = #tpu.core_type<tc>, window_params = [{transform_indices = @transform_0, window_bounds = array<i64: 8, 32>}, {pipeline_mode = #tpu.pipeline_mode<synchronous>, transform_indices = @transform_1, window_bounds = array<i64: 1, 32>}, {pipeline_mode = #tpu.pipeline_mode<synchronous>, transform_indices = @transform_2, window_bounds = array<i64: 1, 32>}, {pipeline_mode = #tpu.pipeline_mode<synchronous>, transform_indices = @transform_3, window_bounds = array<i64: 32, 16>}, {pipeline_mode = #tpu.pipeline_mode<synchronous>, transform_indices = @transform_4, window_bounds = array<i64: 1, 16>}, {pipeline_mode = #tpu.pipeline_mode<synchronous>, transform_indices = @transform_5, window_bounds = array<i64: 16, 32>}, {pipeline_mode = #tpu.pipeline_mode<synchronous>, transform_indices = @transform_6, window_bounds = array<i64: 1, 32>}, {transform_indices = @transform_7, window_bounds = array<i64: 8, 32>}]} {
    %c0 = arith.constant 0 : index
    %c0_0 = arith.constant 0 : index
    %0 = vector.load %arg1[%c0, %c0_0] : memref<8x32xf32, #tpu.memory_space<vmem>>, vector<8x32xf32>
    %c0_1 = arith.constant 0 : index
    %c0_2 = arith.constant 0 : index
    %1 = vector.load %arg2[%c0_1, %c0_2] : memref<1x32xf32, #tpu.memory_space<vmem>>, vector<1x32xf32>
    %2 = vector.broadcast %1 : vector<1x32xf32> to vector<8x32xf32>
    %3 = arith.mulf %0, %2 : vector<8x32xf32>
    %c0_3 = arith.constant 0 : index
    %c0_4 = arith.constant 0 : index
    %4 = vector.load %arg3[%c0_3, %c0_4] : memref<1x32xf32, #tpu.memory_space<vmem>>, vector<1x32xf32>
    %5 = vector.broadcast %4 : vector<1x32xf32> to vector<8x32xf32>
    %6 = arith.addf %3, %5 : vector<8x32xf32>
    %cst = arith.constant 0.000000e+00 : f32
    %7 = vector.broadcast %cst : f32 to vector<8x32xf32>
    %8 = arith.maximumf %6, %7 : vector<8x32xf32>
    %9 = arith.truncf %8 : vector<8x32xf32> to vector<8x32xbf16>
    %c0_5 = arith.constant 0 : index
    %c0_6 = arith.constant 0 : index
    %10 = vector.load %arg4[%c0_5, %c0_6] : memref<32x16xbf16, #tpu.memory_space<vmem>>, vector<32x16xbf16>
    %cst_7 = arith.constant dense<0.000000e+00> : vector<8x16xf32>
    %11 = tpu.matmul %9, %10, %cst_7 {dimension_numbers = #tpu.dot_dimension_numbers<[1], [0], [0], [1], [0, 0, 1, 1], [], []>} : vector<8x32xbf16>, vector<32x16xbf16>, vector<8x16xf32> -> vector<8x16xf32>
    %c0_8 = arith.constant 0 : index
    %c0_9 = arith.constant 0 : index
    %12 = vector.load %arg5[%c0_8, %c0_9] : memref<1x16xf32, #tpu.memory_space<vmem>>, vector<1x16xf32>
    %13 = vector.broadcast %12 : vector<1x16xf32> to vector<8x16xf32>
    %14 = arith.addf %11, %13 : vector<8x16xf32>
    %cst_10 = arith.constant 0.000000e+00 : f32
    %15 = vector.broadcast %cst_10 : f32 to vector<8x16xf32>
    %16 = arith.maximumf %14, %15 : vector<8x16xf32>
    %17 = arith.truncf %16 : vector<8x16xf32> to vector<8x16xbf16>
    %c0_11 = arith.constant 0 : index
    %c0_12 = arith.constant 0 : index
    %18 = vector.load %arg6[%c0_11, %c0_12] : memref<16x32xbf16, #tpu.memory_space<vmem>>, vector<16x32xbf16>
    %cst_13 = arith.constant dense<0.000000e+00> : vector<8x32xf32>
    %19 = tpu.matmul %17, %18, %cst_13 {dimension_numbers = #tpu.dot_dimension_numbers<[1], [0], [0], [1], [0, 0, 1, 1], [], []>} : vector<8x16xbf16>, vector<16x32xbf16>, vector<8x32xf32> -> vector<8x32xf32>
    %c0_14 = arith.constant 0 : index
    %c0_15 = arith.constant 0 : index
    %20 = vector.load %arg7[%c0_14, %c0_15] : memref<1x32xf32, #tpu.memory_space<vmem>>, vector<1x32xf32>
    %21 = vector.broadcast %20 : vector<1x32xf32> to vector<8x32xf32>
    %22 = arith.addf %19, %21 : vector<8x32xf32>
    %c0_16 = arith.constant 0 : index
    %c0_17 = arith.constant 0 : index
    %23 = vector.load %arg1[%c0_16, %c0_17] : memref<8x32xf32, #tpu.memory_space<vmem>>, vector<8x32xf32>
    %24 = arith.addf %22, %23 : vector<8x32xf32>
    %c0_18 = arith.constant 0 : index
    %c0_19 = arith.constant 0 : index
    %25 = vector.load %arg8[%c0_18, %c0_19] : memref<8x32xf32, #tpu.memory_space<vmem>>, vector<8x32xf32>
    tpu.vector_store %arg8[%c0_18, %c0_19], %24 {strides = array<i32>} : memref<8x32xf32, #tpu.memory_space<vmem>>, vector<8x32xf32>,
    return
  }
  func.func @transform_0(%arg0: i32) -> (i32, i32) {
    %c0_i32 = arith.constant 0 : i32
    %c0_i32_0 = arith.constant 0 : i32
    return %arg0, %c0_i32 : i32, i32
  }
  func.func @transform_1(%arg0: i32) -> (i32, i32) {
    %c0_i32 = arith.constant 0 : i32
    %c0_i32_0 = arith.constant 0 : i32
    %c0_i32_1 = arith.constant 0 : i32
    return %c0_i32, %c0_i32_0 : i32, i32
  }
  func.func @transform_2(%arg0: i32) -> (i32, i32) {
    %c0_i32 = arith.constant 0 : i32
    %c0_i32_0 = arith.constant 0 : i32
    %c0_i32_1 = arith.constant 0 : i32
    return %c0_i32, %c0_i32_0 : i32, i32
  }
  func.func @transform_3(%arg0: i32) -> (i32, i32) {
    %c0_i32 = arith.constant 0 : i32
    %c0_i32_0 = arith.constant 0 : i32
    %c0_i32_1 = arith.constant 0 : i32
    return %c0_i32, %c0_i32_0 : i32, i32
  }
  func.func @transform_4(%arg0: i32) -> (i32, i32) {
    %c0_i32 = arith.constant 0 : i32
    %c0_i32_0 = arith.constant 0 : i32
    %c0_i32_1 = arith.constant 0 : i32
    return %c0_i32, %c0_i32_0 : i32, i32
  }
  func.func @transform_5(%arg0: i32) -> (i32, i32) {
    %c0_i32 = arith.constant 0 : i32
    %c0_i32_0 = arith.constant 0 : i32
    %c0_i32_1 = arith.constant 0 : i32
    return %c0_i32, %c0_i32_0 : i32, i32
  }
  func.func @transform_6(%arg0: i32) -> (i32, i32) {
    %c0_i32 = arith.constant 0 : i32
    %c0_i32_0 = arith.constant 0 : i32
    %c0_i32_1 = arith.constant 0 : i32
    return %c0_i32, %c0_i32_0 : i32, i32
  }
  func.func @transform_7(%arg0: i32) -> (i32, i32) {
    %c0_i32 = arith.constant 0 : i32
    %c0_i32_0 = arith.constant 0 : i32
    return %arg0, %c0_i32 : i32, i32
  }
}

</mosaic_0001>

<bundles_post_ra>
// kernel: skipblock_forward.1
= control target key start
LH: loop header
LB: loop body
LE: loop exit
PB: predicated region body
PF: predicated region fallthrough
CT: control target
= control target key end

     0   :  { %v249_v1 = vmov 0.0   ;;  %vm250_vm0 = vmmov 0   ;;  %s330_s0 = inlined_call_operand.vmem [shape: f32[8,32], index: 0, kind: input, shape index: {}]   ;;  %s331_s1 = inlined_call_operand.vmem [shape: f32[1,32], index: 1, kind: input, shape index: {}]   ;;  %s332_s2 = inlined_call_operand.vmem [shape: f32[1,32], index: 2, kind: input, shape index: {}]   ;;  %s333_s3 = inlined_call_operand.vmem [shape: bf16[32,16], index: 3, kind: input, shape index: {}]   ;;  %s334_s4 = inlined_call_operand.vmem [shape: f32[1,16], index: 4, kind: input, shape index: {}]   ;;  %s335_s5 = inlined_call_operand.vmem [shape: bf16[16,32], index: 5, kind: input, shape index: {}]   ;;  %s336_s6 = inlined_call_operand.vmem [shape: f32[1,32], index: 6, kind: input, shape index: {}]   ;;  %s337_s7 = inlined_call_operand.hbm [shape: f32[8,32], index: 7, kind: output, shape index: {}]  }
   0x1   :  { %v222_v0 = vld [vmem:[%s333_s3] sm:$0xff]   ;;  %205 = vmatprep.subr.bf16.mxu0 %v249_v1  ;;  %v223_v2 = vld [vmem:[%s333_s3 + $0x8] sm:$0xff]   ;;  %213 = vmatprep.subr.bf16.mxu1 %v249_v1 }
   0x2   :  { %206 = vmatpush3.bf16.msra.mxu0 %v222_v0  ;;  %209 = vmatprep.mubr.msk.bf16.mxu0 %vm250_vm0, %v249_v1  ;;  %v28_v3 = vld [vmem:[%s330_s0] sm:$0xff] }
   0x3   :  { %v191_v4 = vld [vmem:[%s331_s1] ss:$0 sm:$0xff]  ;;  %207 = vmatprep.subr.bf16.mxu0 %v249_v1  ;;  %215 = vmatprep.mubr.msk.bf16.mxu1 %vm250_vm0, %v249_v1 }
   0x4   :  { %v192_v5 = vld [vmem:[%s332_s2] ss:$0 sm:$0xff]  ;;  %v36_v6 = vmul.f32 %v191_v4, %v28_v3 }
   0x5   :  { %12 = vsyncpa [#allocation3], 0  ;;  %vm70_vm1 = vcmask 261120   ;;  %v224_v10 = vld [vmem:[%s335_s5] sm:$0xff]   ;;  %vm131_vm2 = vcmask 130048   ;;  %s251_s5 = smov [#allocation2]  }
   0x6   :  { %v44_v7 = vadd.f32 %v192_v5, %v36_v6  ;;  %208 = vmatpush3.bf16.msra.mxu0 %v223_v2  ;;  %214 = vmatpush3.bf16.msra.mxu1 %v224_v10  ;;  %v193_v11 = vld [vmem:[%s334_s4] ss:$0 sm:$0xff]  ;;  %s183_s13 = sshll.u32 %s251_s5, 4  ;;  %s184_s13 = int_to_ptr.vmem [resolvable:$true] %s183_s13 }
   0x7   :  { %v197_v19 = vld [vmem:[%s336_s6] ss:$0 sm:$0xff]  ;;  %s225_s4 = scalar_lea.vmem %s184_s13, 128  ;;  %p230_p1 = scmp.lt.s32.totalorder %s184_s13, %s184_s13 }
   0x8   :  { %v45_v8 = vmax.f32 %v44_v7, 0.0  ;;  %p226_p0 = scmp.ne.s32.totalorder %s184_s13, %s225_s4  ;;  %p231_p2 = scmp.lt.s32.totalorder %s225_s4, %s225_s4 }
   0xa   :  { %v46_v9 = vpack.c.bf16 %v45_v8, %v45_v8  ;;  %p232_p3 = por %p231_p2, %p230_p1 }
   0xc   :  { %210 = vmatmul.mubr.msk.bf16.vlgmr.msra.gmra.mrb[0].mxu0 %vm70_vm1, %v46_v9  ;;  %p233_p4 = pnand %p232_p3, %p226_p0 }
  0xdf   :  { %v108_v12 = vpop.f32.mrb[0].mxu0 }
  0xe0   :  { %v109_v13 = vadd.f32 %v193_v11, %v108_v12  ;;  %v211_v14 = vpop.f32.mrb[1].mxu0 }
  0xe1   :  { %v111_v15 = vpop.f32.mrb[2].mxu0 }
  0xe2   :  { %v114_v16 = vmax.f32 %v109_v13, 0.0  ;;  %v212_v17 = vpop.f32.mrb[3].mxu0 }
  0xe4   :  { %v115_v18 = vpack.c.bf16 %v114_v16, %v114_v16 }
  0xe6   :  { %216 = vmatmul.mubr.msk.bf16.vlgmr.msra.gmra.mrb[0].mxu1 %vm131_vm2, %v115_v18 }
 0x1b9   :  { %v169_v20 = vpop.f32.mrb[0].mxu1 }
 0x1ba   :  { %v170_v21 = vadd.f32 %v197_v19, %v169_v20  ;;  %v217_v22 = vpop.f32.mrb[1].mxu1 }
 0x1bb   :  { %v172_v23 = vpop.f32.mrb[2].mxu1 }
 0x1bc   :  { %v175_v24 = vadd.f32 %v170_v21, %v28_v3  ;;  %v218_v25 = vpop.f32.mrb[3].mxu1 }
 0x1be   :  { %176 = vst.msk [vmem:[#allocation2] sm:$0xff] %vm70_vm1, %v175_v24 }
 0x1bf   :  { %236 = shalt.err (!%p233_p4)
}
 0x1c0   :  { %s237_s15 = scalar_lea.hbm %s337_s7, 128 }
 0x1c1   :  { %p238_p5 = scmp.ne.s32.totalorder %s337_s7, %s237_s15  ;;  %p241_p6 = scmp.lt.u32.totalorder %s237_s15, %s337_s7 }
 0x1c3   :  { %p243_p7 = pnand %p241_p6, %p238_p5 }
 0x1c5   :  { %246 = shalt.err (!%p243_p7)
}
 0x1c6   :  { %186 = dma.vmem_to_hbm [thread:$0]  %s184_s13, 128, %s337_s7, [#allocation3]  }
 0x1c7   :  { %247 = dma.done.wait [#allocation3], 128  }
 0x1c8   :  { %248 = vsyncadd [#allocation3], 4294967168 }
 0x1c9   :  { %190 = vsyncpa [#allocation3], 1 }

</bundles_post_ra>
